<compile_context>
chip_gen: v5e
topology: v5e:2x2
jax: 0.10.0
libtpu: 0.0.40
codegen_flags: <defaults>
</compile_context>

<pallas_src>
import functools

import jax
import jax.numpy as jnp
from jax.experimental import pallas as pl
from jax.experimental.pallas import tpu as pltpu


# ----------------------------------------------------------------------------- kernels

def ffn_resident_kernel(x_ref, w1_ref, b1_ref, w2_ref, b2_ref, o_ref):
    # Weights fully resident in VMEM (constant block index over the grid).
    # x_ref: (tm, dmp) in the input dtype; cast to compute dtype in-kernel.
    x = x_ref[...].astype(w1_ref.dtype)
    h = jnp.dot(x, w1_ref[...], preferred_element_type=jnp.float32)
    h = jnp.maximum(h + b1_ref[...], 0.0)
    # dropout: identity in eval mode.
    out = jnp.dot(h.astype(w2_ref.dtype), w2_ref[...],
                  preferred_element_type=jnp.float32)
    o_ref[...] = (out + b2_ref[...]).astype(o_ref.dtype)


def ffn_tiled_kernel(x_ref, w1_ref, b1_ref, w2_ref, b2_ref, o_ref, *acc):
    # d_ff tiled along grid axis 1 (innermost, "arbitrary").
    # If no scratch is passed (f32 output), accumulate directly into o_ref, which is
    # resident across the j axis.
    acc_ref = acc[0] if acc else o_ref
    j = pl.program_id(1)

    @pl.when(j == 0)
    def _init():
        acc_ref[...] = jnp.zeros_like(acc_ref)

    x = x_ref[...].astype(w1_ref.dtype)
    h = jnp.dot(x, w1_ref[...], preferred_element_type=jnp.float32)
    h = jnp.maximum(h + b1_ref[...], 0.0)
    # dropout: identity in eval mode.
    acc_ref[...] += jnp.dot(h.astype(w2_ref.dtype), w2_ref[...],
                            preferred_element_type=jnp.float32)

    @pl.when(j == pl.num_programs(1) - 1)
    def _finalize():
        if acc:
            o_ref[...] = (acc_ref[...] + b2_ref[...]).astype(o_ref.dtype)
        else:
            o_ref[...] = o_ref[...] + b2_ref[...]


# ----------------------------------------------------------------------------- helpers

def _round_up(a, m):
    return (a + m - 1) // m * m


def _tpu_vmem_and_kind():
    kind = ""
    try:
        kind = jax.devices()[0].device_kind.lower()
    except Exception:
        pass
    vmem = None
    try:
        vmem = int(pltpu.get_tpu_info().vmem_capacity_bytes)
    except Exception:
        vmem = None
    if vmem is None:
        if "v7" in kind or "7x" in kind:
            vmem = 64 << 20
        elif "v5" in kind or "v6" in kind or "v4" in kind:
            vmem = 128 << 20
        else:
            vmem = 64 << 20          # conservative default
    return vmem, kind


def _select_config(tokens, dmp, dfp, *, x_bytes, out_bytes, c_bytes, out_is_f32):
    """Pick (tm, tf, resident, vmem_limit) from a VMEM budget model."""
    vmem_phys, _ = _tpu_vmem_and_kind()
    small_vmem = vmem_phys <= (64 << 20)             # v7x-class TensorCore
    # Usable budget: leave headroom for compiler-internal scratch.
    vmem_cap = min(int(vmem_phys * 0.80), (52 << 20) if small_vmem else (100 << 20))
    tm_target = 512 if small_vmem else 1024          # v7x: smaller tm -> >=2 tiles for megacore
    min_tm = 16                                      # >= bf16 sublane tile

    tm_full = max(min_tm, _round_up(tokens, min_tm))
    cands = sorted({min(t, tm_full)
                    for t in (1024, 768, 512, 384, 256, 128, 64, 32, 16)
                    if t <= tm_target}, reverse=True)

    def resident_need(tm):
        return (2 * tm * dmp * (x_bytes + out_bytes)      # x / out tiles, double-buffered
                + 2 * 2 * dmp * dfp * c_bytes             # W1 + W2 (assume double-buffered)
                + 2 * (dfp + dmp) * 4                     # biases
                + tm * dfp * (4 + c_bytes))               # live f32 h + its cast

    def tiled_need(tm, tf):
        acc_b = 0 if out_is_f32 else tm * dmp * 4
        return (2 * tm * dmp * (x_bytes + out_bytes)
                + 2 * 2 * dmp * tf * c_bytes
                + 2 * (tf + dmp) * 4
                + tm * tf * (4 + c_bytes)
                + acc_b)

    def limit(need):
        return int(min(vmem_cap, max(need + (8 << 20), 32 << 20)))

    # 1) Full-weight residency: weights DMA'd once, no d_ff grid axis, no acc RMW.
    for tm in cands:
        need = resident_need(tm)
        if need <= vmem_cap:
            return dict(tm=tm, tf=dfp, resident=True, vmem_limit=limit(need))

    # 2) Tile d_ff (innermost "arbitrary" axis), largest chunk that fits.
    tf_cands = [t for t in range(min(dfp, 1024), 0, -128) if dfp % t == 0]
    for tm in cands:
        for tf in tf_cands:
            need = tiled_need(tm, tf)
            if need <= vmem_cap:
                return dict(tm=tm, tf=tf, resident=False, vmem_limit=limit(need))

    # Last resort: minimal tiles.
    return dict(tm=min_tm, tf=128, resident=False, vmem_limit=int(vmem_cap))


# ----------------------------------------------------------------------------- core

@functools.partial(jax.jit, static_argnames=("tm", "tf", "resident", "vmem_limit"))
def _ffn_forward(x, w1p, b1p, w2p, b2p, *, tm, tf, resident, vmem_limit):
    """x: [B, S, d_model] -> [B, S, d_model]; padded/cast weights are pre-built."""
    B, S, d_model = x.shape
    tokens = B * S
    dmp = w1p.shape[0]
    dfp = w1p.shape[1]
    out_dtype = x.dtype

    tkp = _round_up(max(tokens, tm), tm)
    x2d = x.reshape(tokens, d_model)
    pad_rows = tkp - tokens
    pad_cols = dmp - d_model
    if pad_rows or pad_cols:                 # skipped in the aligned (common) case
        x2d = jnp.pad(x2d, ((0, pad_rows), (0, pad_cols)))

    n_i = tkp // tm
    cw = w1p.dtype.itemsize
    ow = jnp.dtype(out_dtype).itemsize
    weight_bytes = (w1p.size + w2p.size) * cw
    streams = 1 if resident else n_i         # weights re-streamed once per token tile
    cost = pl.CostEstimate(
        flops=4 * tokens * d_model * dfp,    # two matmuls
        transcendentals=0,
        bytes_accessed=(x2d.size * x2d.dtype.itemsize
                        + tkp * dmp * ow
                        + weight_bytes * streams
                        + (b1p.size + b2p.size) * 4),
    )

    if resident:
        out2d = pl.pallas_call(
            ffn_resident_kernel,
            out_shape=jax.ShapeDtypeStruct((tkp, dmp), out_dtype),
            grid_spec=pltpu.PrefetchScalarGridSpec(
                num_scalar_prefetch=0,
                grid=(n_i,),
                in_specs=[
                    pl.BlockSpec((tm, dmp), lambda i: (i, 0)),     # x tile
                    pl.BlockSpec((dmp, dfp), lambda i: (0, 0)),    # W1 (resident)
                    pl.BlockSpec((1, dfp), lambda i: (0, 0)),      # b1
                    pl.BlockSpec((dfp, dmp), lambda i: (0, 0)),    # W2 (resident)
                    pl.BlockSpec((1, dmp), lambda i: (0, 0)),      # b2
                ],
                out_specs=pl.BlockSpec((tm, dmp), lambda i: (i, 0)),
            ),
            compiler_params=pltpu.CompilerParams(
                dimension_semantics=("parallel",),
                vmem_limit_bytes=vmem_limit,
            ),
            cost_estimate=cost,
        )(x2d, w1p, b1p, w2p, b2p)
    else:
        out_is_f32 = jnp.dtype(out_dtype) == jnp.float32
        scratch = [] if out_is_f32 else [pltpu.VMEM((tm, dmp), jnp.float32)]
        out2d = pl.pallas_call(
            ffn_tiled_kernel,
            out_shape=jax.ShapeDtypeStruct((tkp, dmp), out_dtype),
            grid_spec=pltpu.PrefetchScalarGridSpec(
                num_scalar_prefetch=0,
                grid=(n_i, dfp // tf),
                in_specs=[
                    pl.BlockSpec((tm, dmp), lambda i, j: (i, 0)),  # x tile
                    pl.BlockSpec((dmp, tf), lambda i, j: (0, j)),  # W1 chunk
                    pl.BlockSpec((1, tf), lambda i, j: (0, j)),    # b1 chunk
                    pl.BlockSpec((tf, dmp), lambda i, j: (j, 0)),  # W2 chunk
                    pl.BlockSpec((1, dmp), lambda i, j: (0, 0)),   # b2
                ],
                out_specs=pl.BlockSpec((tm, dmp), lambda i, j: (i, 0)),
                scratch_shapes=scratch,
            ),
            compiler_params=pltpu.CompilerParams(
                dimension_semantics=("parallel", "arbitrary"),
                vmem_limit_bytes=vmem_limit,
            ),
            cost_estimate=cost,
        )(x2d, w1p, b1p, w2p, b2p)

    if pad_rows or pad_cols:
        out2d = out2d[:tokens, :d_model]
    return out2d.reshape(B, S, d_model)


# ----------------------------------------------------------------------------- module

class PallasPositionwiseFeedForward:
    """Pallas-TPU equivalent of the PyTorch PositionwiseFeedForward (eval mode).

    Weights are stored pre-transposed relative to nn.Linear.weight:
      w1: [d_model, d_ff], b1: [d_ff], w2: [d_ff, d_model], b2: [d_model].
    Padding + compute-dtype cast of the parameters happens ONCE here (hoisted out
    of the per-call hot path).
    TODO(synk): dropout is identity (inference); training-mode dropout not applied.
    """

    def __init__(self, w1, b1, w2, b2, *, compute_dtype=jnp.bfloat16):
        d_model, d_ff = w1.shape
        self.d_model, self.d_ff = d_model, d_ff
        self.compute_dtype = jnp.dtype(compute_dtype)
        self.dmp = _round_up(max(d_model, 128), 128)   # lane-dense output width
        self.dfp = _round_up(max(d_ff, 128), 128)
        self.w1p = jnp.pad(w1, ((0, self.dmp - d_model), (0, self.dfp - d_ff))
                           ).astype(self.compute_dtype)
        self.w2p = jnp.pad(w2, ((0, self.dfp - d_ff), (0, self.dmp - d_model))
                           ).astype(self.compute_dtype)
        self.b1p = jnp.pad(b1, (0, self.dfp - d_ff)).reshape(1, self.dfp).astype(jnp.float32)
        self.b2p = jnp.pad(b2, (0, self.dmp - d_model)).reshape(1, self.dmp).astype(jnp.float32)

    def __call__(self, x):
        B, S, d_model = x.shape
        assert d_model == self.d_model
        tokens = B * S
        cfg = _select_config(
            tokens, self.dmp, self.dfp,
            x_bytes=jnp.dtype(x.dtype).itemsize,
            out_bytes=jnp.dtype(x.dtype).itemsize,
            c_bytes=self.compute_dtype.itemsize,
            out_is_f32=(jnp.dtype(x.dtype) == jnp.float32),
        )
        return _ffn_forward(x, self.w1p, self.b1p, self.w2p, self.b2p,
                            tm=cfg["tm"], tf=cfg["tf"],
                            resident=cfg["resident"], vmem_limit=cfg["vmem_limit"])


# ----------------------------------------------------------------------------- demo / test

if __name__ == "__main__":
    # Small shapes: batch=2, seq=8, d_model=32, d_ff=64
    B, S, d_model, d_ff = 2, 8, 32, 64

    key = jax.random.PRNGKey(0)
    kx, kw1, kb1, kw2, kb2 = jax.random.split(key, 5)

    x = jax.random.normal(kx, (B, S, d_model), dtype=jnp.float32)

    # Deterministic param init (uniform like nn.Linear's default range),
    # stored pre-transposed: w1 [d_model, d_ff], w2 [d_ff, d_model].
    lim1 = 1.0 / (d_model ** 0.5)
    lim2 = 1.0 / (d_ff ** 0.5)
    w1 = jax.random.uniform(kw1, (d_model, d_ff), jnp.float32, -lim1, lim1)
    b1 = jax.random.uniform(kb1, (d_ff,), jnp.float32, -lim1, lim1)
    w2 = jax.random.uniform(kw2, (d_ff, d_model), jnp.float32, -lim2, lim2)
    b2 = jax.random.uniform(kb2, (d_model,), jnp.float32, -lim2, lim2)

    # Reference in plain JAX (same eval-mode semantics).
    ref = jnp.maximum(x @ w1 + b1, 0.0) @ w2 + b2

    # f32 compute path: tight correctness check (auto-selected resident kernel).
    ffn_f32 = PallasPositionwiseFeedForward(w1, b1, w2, b2, compute_dtype=jnp.float32)
    out_f32 = jax.block_until_ready(ffn_f32(x))
    assert out_f32.shape == (B, S, d_model)
    assert jnp.allclose(out_f32, ref, atol=1e-5, rtol=1e-5)

    # bf16 compute path (default, performance configuration): looser tolerance.
    ffn_bf16 = PallasPositionwiseFeedForward(w1, b1, w2, b2)
    out_bf16 = jax.block_until_ready(ffn_bf16(x))
    assert out_bf16.shape == (B, S, d_model)
    assert jnp.allclose(out_bf16, ref, atol=5e-2, rtol=5e-2)

    # Force the tiled-d_ff fallback path (f32 output -> accumulate directly in o_ref).
    out_tiled = jax.block_until_ready(
        _ffn_forward(x, ffn_f32.w1p, ffn_f32.b1p, ffn_f32.w2p, ffn_f32.b2p,
                     tm=16, tf=128, resident=False, vmem_limit=32 << 20))
    assert jnp.allclose(out_tiled, ref, atol=1e-5, rtol=1e-5)

    # Tiled path with bf16 input/output (exercises the f32 accumulator scratch).
    xb = x.astype(jnp.bfloat16)
    out_tb = jax.block_until_ready(
        _ffn_forward(xb, ffn_bf16.w1p, ffn_bf16.b1p, ffn_bf16.w2p, ffn_bf16.b2p,
                     tm=16, tf=128, resident=False, vmem_limit=32 << 20))
    assert out_tb.dtype == jnp.bfloat16
    assert jnp.allclose(out_tb.astype(jnp.float32), ref, atol=1.5e-1, rtol=1.5e-1)

    print("KERNEL_OK")
</pallas_src>

<mosaic_0001>
module attributes {stable_mosaic.version = 11 : i64} {
  func.func @ffn_resident_kernel(%arg0: i32, %arg1: memref<16x128xf32, #tpu.memory_space<vmem>>, %arg2: memref<128x128xf32, #tpu.memory_space<vmem>>, %arg3: memref<1x128xf32, #tpu.memory_space<vmem>>, %arg4: memref<128x128xf32, #tpu.memory_space<vmem>>, %arg5: memref<1x128xf32, #tpu.memory_space<vmem>>, %arg6: memref<16x128xf32, #tpu.memory_space<vmem>>) attributes {dimension_semantics = [#tpu.dimension_semantics<parallel>], iteration_bounds = array<i64: 1>, scalar_prefetch = 0 : i64, scratch_operands = 0 : i64, tpu.core_type = #tpu.core_type<tc>, window_params = [{transform_indices = @transform_0, window_bounds = array<i64: 16, 128>}, {pipeline_mode = #tpu.pipeline_mode<synchronous>, transform_indices = @transform_1, window_bounds = array<i64: 128, 128>}, {pipeline_mode = #tpu.pipeline_mode<synchronous>, transform_indices = @transform_2, window_bounds = array<i64: 1, 128>}, {pipeline_mode = #tpu.pipeline_mode<synchronous>, transform_indices = @transform_3, window_bounds = array<i64: 128, 128>}, {pipeline_mode = #tpu.pipeline_mode<synchronous>, transform_indices = @transform_4, window_bounds = array<i64: 1, 128>}, {transform_indices = @transform_5, window_bounds = array<i64: 16, 128>}]} {
    %c0 = arith.constant 0 : index
    %c0_0 = arith.constant 0 : index
    %0 = vector.load %arg1[%c0, %c0_0] : memref<16x128xf32, #tpu.memory_space<vmem>>, vector<16x128xf32>
    %c0_1 = arith.constant 0 : index
    %c0_2 = arith.constant 0 : index
    %1 = vector.load %arg2[%c0_1, %c0_2] : memref<128x128xf32, #tpu.memory_space<vmem>>, vector<128x128xf32>
    %cst = arith.constant dense<0.000000e+00> : vector<16x128xf32>
    %2 = tpu.matmul %0, %1, %cst {dimension_numbers = #tpu.dot_dimension_numbers<[1], [0], [0], [1], [0, 0, 1, 1], [], []>} : vector<16x128xf32>, vector<128x128xf32>, vector<16x128xf32> -> vector<16x128xf32>
    %c0_3 = arith.constant 0 : index
    %c0_4 = arith.constant 0 : index
    %3 = vector.load %arg3[%c0_3, %c0_4] : memref<1x128xf32, #tpu.memory_space<vmem>>, vector<1x128xf32>
    %4 = vector.broadcast %3 : vector<1x128xf32> to vector<16x128xf32>
    %5 = arith.addf %2, %4 : vector<16x128xf32>
    %cst_5 = arith.constant 0.000000e+00 : f32
    %6 = vector.broadcast %cst_5 : f32 to vector<16x128xf32>
    %7 = arith.maximumf %5, %6 : vector<16x128xf32>
    %c0_6 = arith.constant 0 : index
    %c0_7 = arith.constant 0 : index
    %8 = vector.load %arg4[%c0_6, %c0_7] : memref<128x128xf32, #tpu.memory_space<vmem>>, vector<128x128xf32>
    %cst_8 = arith.constant dense<0.000000e+00> : vector<16x128xf32>
    %9 = tpu.matmul %7, %8, %cst_8 {dimension_numbers = #tpu.dot_dimension_numbers<[1], [0], [0], [1], [0, 0, 1, 1], [], []>} : vector<16x128xf32>, vector<128x128xf32>, vector<16x128xf32> -> vector<16x128xf32>
    %c0_9 = arith.constant 0 : index
    %c0_10 = arith.constant 0 : index
    %10 = vector.load %arg5[%c0_9, %c0_10] : memref<1x128xf32, #tpu.memory_space<vmem>>, vector<1x128xf32>
    %11 = vector.broadcast %10 : vector<1x128xf32> to vector<16x128xf32>
    %12 = arith.addf %9, %11 : vector<16x128xf32>
    %c0_11 = arith.constant 0 : index
    %c0_12 = arith.constant 0 : index
    %13 = vector.load %arg6[%c0_11, %c0_12] : memref<16x128xf32, #tpu.memory_space<vmem>>, vector<16x128xf32>
    tpu.vector_store %arg6[%c0_11, %c0_12], %12 {strides = array<i32>} : memref<16x128xf32, #tpu.memory_space<vmem>>, vector<16x128xf32>,
    return
  }
  func.func @transform_0(%arg0: i32) -> (i32, i32) {
    %c0_i32 = arith.constant 0 : i32
    %c0_i32_0 = arith.constant 0 : i32
    return %arg0, %c0_i32 : i32, i32
  }
  func.func @transform_1(%arg0: i32) -> (i32, i32) {
    %c0_i32 = arith.constant 0 : i32
    %c0_i32_0 = arith.constant 0 : i32
    %c0_i32_1 = arith.constant 0 : i32
    return %c0_i32, %c0_i32_0 : i32, i32
  }
  func.func @transform_2(%arg0: i32) -> (i32, i32) {
    %c0_i32 = arith.constant 0 : i32
    %c0_i32_0 = arith.constant 0 : i32
    %c0_i32_1 = arith.constant 0 : i32
    return %c0_i32, %c0_i32_0 : i32, i32
  }
  func.func @transform_3(%arg0: i32) -> (i32, i32) {
    %c0_i32 = arith.constant 0 : i32
    %c0_i32_0 = arith.constant 0 : i32
    %c0_i32_1 = arith.constant 0 : i32
    return %c0_i32, %c0_i32_0 : i32, i32
  }
  func.func @transform_4(%arg0: i32) -> (i32, i32) {
    %c0_i32 = arith.constant 0 : i32
    %c0_i32_0 = arith.constant 0 : i32
    %c0_i32_1 = arith.constant 0 : i32
    return %c0_i32, %c0_i32_0 : i32, i32
  }
  func.func @transform_5(%arg0: i32) -> (i32, i32) {
    %c0_i32 = arith.constant 0 : i32
    %c0_i32_0 = arith.constant 0 : i32
    return %arg0, %c0_i32 : i32, i32
  }
}

</mosaic_0001>

<bundles_post_ra>
// kernel: _ffn_forward.1
= control target key start
LH: loop header
LB: loop body
LE: loop exit
PB: predicated region body
PF: predicated region fallthrough
CT: control target
= control target key end

     0   :  { %10 = vsyncpa [#allocation3], 0  ;;  %s298_s0 = inlined_call_operand.vmem [shape: f32[16,128], index: 0, kind: input, shape index: {}]   ;;  %s299_s1 = inlined_call_operand.hbm [shape: f32[128,128], index: 1, kind: input, shape index: {}]   ;;  %s300_s2 = inlined_call_operand.vmem [shape: f32[1,128], index: 2, kind: input, shape index: {}]   ;;  %s301_s3 = inlined_call_operand.hbm [shape: f32[128,128], index: 3, kind: input, shape index: {}]   ;;  %s302_s4 = inlined_call_operand.vmem [shape: f32[1,128], index: 4, kind: input, shape index: {}]   ;;  %s303_s5 = inlined_call_operand.vmem [shape: f32[16,128], index: 5, kind: output, shape index: {}]  }
   0x1   :  { %s18_s20 = sshll.u32 %s299_s1, 4  ;;  %s19_s20 = int_to_ptr.hbm [resolvable:$true] %s18_s20 }
   0x2   :  { %11 = vsyncpa [#allocation5], 0  ;;  %s240_s21 = smov [#allocation2]   ;;  %s33_s25 = sshll.u32 %s301_s3, 4  ;;  %s34_s25 = int_to_ptr.hbm [resolvable:$true] %s33_s25 }
   0x3   :  { %s20_s22 = sshll.u32 %s240_s21, 4  ;;  %s241_s26 = smov 128   ;;  %s21_s22 = int_to_ptr.vmem [resolvable:$true] %s20_s22 }
   0x4   :  { %s242_s27 = smov 8   ;;  %s243_s28 = smov [#allocation4]  }
   0x5   :  { %26 = dma.hbm_to_vmem [thread:$0]  %s19_s20, 2048, %s21_s22, [#allocation3], %s241_s26, %s241_s26, %s242_s27  }
   0x6   :  { %s35_s29 = sshll.u32 %s243_s28, 4  ;;  %s36_s29 = int_to_ptr.vmem [resolvable:$true] %s35_s29 }
   0x7   :  { %41 = dma.hbm_to_vmem [thread:$0]  %s34_s25, 2048, %s36_s29, [#allocation5], %s241_s26, %s241_s26, %s242_s27  }
   0x8   :  { %236 = dma.done.wait [#allocation3], 2048  }
   0x9   :  { %237 = vsyncadd [#allocation3], 4294965248 }
   0xa   :  { %238 = dma.done.wait [#allocation5], 2048  }
   0xb   :  { %239 = vsyncadd [#allocation5], 4294965248  ;;  %v69_v0 = vld [vmem:[#allocation2 + $0x78] sm:$0xff]  ;;  %v68_v1 = vld [vmem:[#allocation2 + $0x70] sm:$0xff] }
   0xc   :  { %150 = vmatpush.msra.mxu2 %v69_v0  ;;  %74 = vmatpush.msra.mxu0 %v69_v0  ;;  %v67_v2 = vld [vmem:[#allocation2 + $0x68] sm:$0xff]  ;;  %v66_v3 = vld [vmem:[#allocation2 + $0x60] sm:$0xff]  ;;  %v65_v4 = vld [vmem:[#allocation2 + $0x58] sm:$0xff] }
   0xd   :  { %v114_v5 = vld [vmem:[#allocation4 + $0x78] sm:$0xff]  ;;  %v113_v6 = vld [vmem:[#allocation4 + $0x70] sm:$0xff]  ;;  %v112_v8 = vld [vmem:[#allocation4 + $0x68] sm:$0xff] }
   0xe   :  { %151 = vmatpush.msra.mxu2 %v68_v1  ;;  %75 = vmatpush.msra.mxu0 %v68_v1  ;;  %v64_v7 = vld [vmem:[#allocation2 + $0x50] sm:$0xff]  ;;  %v63_v9 = vld [vmem:[#allocation2 + $0x48] sm:$0xff]  ;;  %v111_v10 = vld [vmem:[#allocation4 + $0x60] sm:$0xff] }
   0xf   :  { %166 = vmatpush.msra.mxu3 %v114_v5  ;;  %119 = vmatpush.msra.mxu1 %v114_v5  ;;  %v62_v11 = vld [vmem:[#allocation2 + $0x40] sm:$0xff]  ;;  %v110_v12 = vld [vmem:[#allocation4 + $0x58] sm:$0xff]  ;;  %v109_v14 = vld [vmem:[#allocation4 + $0x50] sm:$0xff] }
  0x10   :  { %152 = vmatpush.msra.mxu2 %v67_v2  ;;  %76 = vmatpush.msra.mxu0 %v67_v2  ;;  %v61_v13 = vld [vmem:[#allocation2 + $0x38] sm:$0xff]  ;;  %v60_v15 = vld [vmem:[#allocation2 + $0x30] sm:$0xff]  ;;  %v108_v16 = vld [vmem:[#allocation4 + $0x48] sm:$0xff] }
  0x11   :  { %167 = vmatpush.msra.mxu3 %v113_v6  ;;  %120 = vmatpush.msra.mxu1 %v113_v6  ;;  %v59_v17 = vld [vmem:[#allocation2 + $0x28] sm:$0xff]  ;;  %v107_v18 = vld [vmem:[#allocation4 + $0x40] sm:$0xff]  ;;  %v106_v20 = vld [vmem:[#allocation4 + $0x38] sm:$0xff] }
  0x12   :  { %153 = vmatpush.msra.mxu2 %v66_v3  ;;  %77 = vmatpush.msra.mxu0 %v66_v3  ;;  %v58_v19 = vld [vmem:[#allocation2 + $0x20] sm:$0xff]  ;;  %v57_v21 = vld [vmem:[#allocation2 + $0x18] sm:$0xff]  ;;  %v105_v22 = vld [vmem:[#allocation4 + $0x30] sm:$0xff] }
  0x13   :  { %168 = vmatpush.msra.mxu3 %v112_v8  ;;  %121 = vmatpush.msra.mxu1 %v112_v8  ;;  %v56_v23 = vld [vmem:[#allocation2 + $0x10] sm:$0xff]  ;;  %v104_v24 = vld [vmem:[#allocation4 + $0x28] sm:$0xff]  ;;  %v103_v26 = vld [vmem:[#allocation4 + $0x20] sm:$0xff] }
  0x14   :  { %154 = vmatpush.msra.mxu2 %v65_v4  ;;  %78 = vmatpush.msra.mxu0 %v65_v4  ;;  %v55_v25 = vld [vmem:[#allocation2 + $0x8] sm:$0xff]  ;;  %v54_v27 = vld [vmem:[#allocation2] sm:$0xff]  ;;  %v102_v30 = vld [vmem:[#allocation4 + $0x18] sm:$0xff] }
  0x15   :  { %169 = vmatpush.msra.mxu3 %v111_v10  ;;  %122 = vmatpush.msra.mxu1 %v111_v10  ;;  %v53_v28 = vld [vmem:[%s298_s0 + $0x8] sm:$0xff]  ;;  %v52_v29 = vld [vmem:[%s298_s0] sm:$0xff]  ;;  %v101_v31 = vld [vmem:[#allocation4 + $0x10] sm:$0xff] }
  0x16   :  { %155 = vmatpush.msra.mxu2 %v64_v7  ;;  %79 = vmatpush.msra.mxu0 %v64_v7  ;;  %v100_v32 = vld [vmem:[#allocation4 + $0x8] sm:$0xff]  ;;  %v99_v33 = vld [vmem:[#allocation4] sm:$0xff] }
  0x17   :  { %170 = vmatpush.msra.mxu3 %v110_v12  ;;  %123 = vmatpush.msra.mxu1 %v110_v12  ;;  %v186_v34 = vld [vmem:[%s300_s2] ss:$0 sm:$0xff] }
  0x18   :  { %156 = vmatpush.msra.mxu2 %v63_v9  ;;  %80 = vmatpush.msra.mxu0 %v63_v9  ;;  %v187_v41 = vld [vmem:[%s302_s4] ss:$0 sm:$0xff] }
  0x19   :  { %171 = vmatpush.msra.mxu3 %v109_v14  ;;  %124 = vmatpush.msra.mxu1 %v109_v14 }
  0x1a   :  { %157 = vmatpush.msra.mxu2 %v62_v11  ;;  %81 = vmatpush.msra.mxu0 %v62_v11 }
  0x1b   :  { %172 = vmatpush.msra.mxu3 %v108_v16  ;;  %125 = vmatpush.msra.mxu1 %v108_v16 }
  0x1c   :  { %158 = vmatpush.msra.mxu2 %v61_v13  ;;  %82 = vmatpush.msra.mxu0 %v61_v13 }
  0x1d   :  { %173 = vmatpush.msra.mxu3 %v107_v18  ;;  %126 = vmatpush.msra.mxu1 %v107_v18 }
  0x1e   :  { %159 = vmatpush.msra.mxu2 %v60_v15  ;;  %83 = vmatpush.msra.mxu0 %v60_v15 }
  0x1f   :  { %174 = vmatpush.msra.mxu3 %v106_v20  ;;  %127 = vmatpush.msra.mxu1 %v106_v20 }
  0x20   :  { %160 = vmatpush.msra.mxu2 %v59_v17  ;;  %84 = vmatpush.msra.mxu0 %v59_v17 }
  0x21   :  { %175 = vmatpush.msra.mxu3 %v105_v22  ;;  %128 = vmatpush.msra.mxu1 %v105_v22 }
  0x22   :  { %161 = vmatpush.msra.mxu2 %v58_v19  ;;  %85 = vmatpush.msra.mxu0 %v58_v19 }
  0x23   :  { %176 = vmatpush.msra.mxu3 %v104_v24  ;;  %129 = vmatpush.msra.mxu1 %v104_v24 }
  0x24   :  { %162 = vmatpush.msra.mxu2 %v57_v21  ;;  %86 = vmatpush.msra.mxu0 %v57_v21 }
  0x25   :  { %177 = vmatpush.msra.mxu3 %v103_v26  ;;  %130 = vmatpush.msra.mxu1 %v103_v26 }
  0x26   :  { %163 = vmatpush.msra.mxu2 %v56_v23  ;;  %87 = vmatpush.msra.mxu0 %v56_v23 }
  0x27   :  { %178 = vmatpush.msra.mxu3 %v102_v30  ;;  %131 = vmatpush.msra.mxu1 %v102_v30 }
  0x28   :  { %164 = vmatpush.msra.mxu2 %v55_v25  ;;  %88 = vmatpush.msra.mxu0 %v55_v25 }
  0x29   :  { %179 = vmatpush.msra.mxu3 %v101_v31  ;;  %132 = vmatpush.msra.mxu1 %v101_v31 }
  0x2a   :  { %165 = vmatpush.msra.mxu2 %v54_v27  ;;  %89 = vmatpush.msra.mxu0 %v54_v27 }
  0x2b   :  { %93 = vmatmul.f32.vlgmr.msra.gmra.mxu2 %v53_v28  ;;  %90 = vmatmul.f32.vlgmr.msra.gmra.mxu0 %v52_v29 }
  0x2c   :  { %180 = vmatpush.msra.mxu3 %v100_v32  ;;  %133 = vmatpush.msra.mxu1 %v100_v32 }
  0x2e   :  { %181 = vmatpush.msra.mxu3 %v99_v33  ;;  %134 = vmatpush.msra.mxu1 %v99_v33 }
  0xa8   :  { %v91_v35 = vpop.f32.mrf.mxu0 }
  0xa9   :  { %v92_v36 = vadd.f32 %v186_v34, %v91_v35 }
  0xab   :  { %v97_v37 = vmax.f32 %v92_v36, 0.0 }
  0xad   :  { %135 = vmatmul.f32.vlgmr.msra.gmra.mxu1 %v97_v37 }
  0xae   :  { %v94_v38 = vpop.f32.mrf.mxu2 }
  0xaf   :  { %v95_v39 = vadd.f32 %v186_v34, %v94_v38 }
  0xb1   :  { %v98_v40 = vmax.f32 %v95_v39, 0.0 }
  0xb3   :  { %138 = vmatmul.f32.vlgmr.msra.gmra.mxu3 %v98_v40 }
 0x12a   :  { %v136_v42 = vpop.f32.mrf.mxu1 }
 0x12b   :  { %v137_v43 = vadd.f32 %v187_v41, %v136_v42 }
 0x12d   :  { %142 = vst [vmem:[%s303_s5] sm:$0xff] %v137_v43 }
 0x136   :  { %v139_v44 = vpop.f32.mrf.mxu3 }
 0x137   :  { %v140_v45 = vadd.f32 %v187_v41, %v139_v44 }
 0x139   :  { %143 = vst [vmem:[%s303_s5 + $0x8] sm:$0xff] %v140_v45 }
 0x13a   :  { %148 = vsyncpa [#allocation3], 1 }
 0x13b   :  { %149 = vsyncpa [#allocation5], 1 }

</bundles_post_ra>
